<compile_context>
chip_gen: v5e
topology: v5e:2x2
jax: 0.10.0
libtpu: 0.0.40
codegen_flags: <defaults>
</compile_context>

<pallas_src>
import jax
import jax.numpy as jnp
from jax import lax
from jax.experimental import pallas as pl
from jax.experimental.pallas import tpu as pltpu

_MIB = 1024 * 1024


def _round_up(v, m):
    return ((v + m - 1) // m) * m


def branch_kernel(x_ref, w1_ref, b1_ref, w2_ref, b2_ref, o_ref):
    # hidden = relu(x @ W1 + b1)                       (tile_b, d_hid), f32 accumulation
    h = jnp.dot(x_ref[...], w1_ref[...], preferred_element_type=jnp.float32)
    h = jnp.maximum(h + b1_ref[...], 0.0)
    # lane-dense output:  (1, d_hid) contracted with (tile_b, d_hid) -> (1, tile_b)
    o = lax.dot_general(
        w2_ref[...], h,
        dimension_numbers=(((1,), (1,)), ((), ())),
        preferred_element_type=jnp.float32,
    )
    o_ref[...] = (o + b2_ref[0, 0]).astype(o_ref.dtype)


def _vmem_limit_bytes():
    """Per-generation VMEM budget (bytes) with headroom for compiler scratch."""
    try:
        cap = pltpu.get_tpu_info().vmem_capacity_bytes
    except Exception:
        cap = 64 * _MIB  # conservative: v7x per-TensorCore VMEM
    # ~48 MiB on v7x (64 MiB/TC), ~100 MiB on v5e/v6e (128 MiB).
    return int(max(32 * _MIB, min(cap - 16 * _MIB, 100 * _MIB)))


def branch_forward(x, w1, b1, w2, b2, *, tile_b=8192):
    """Branch forward pass.

    x  : (B, d_in)
    w1 : (d_in, d_hid)   -- fc1 weight, stored transposed vs. torch
    b1 : (1, d_hid)      -- fc1 bias
    w2 : (1, d_hid)      -- fcoutput weight (same layout as torch nn.Linear(d_hid, 1))
    b2 : (1, 1)          -- fcoutput bias
    returns (B, 1)
    """
    B, d_in = x.shape
    d_hid = w1.shape[1]
    itemsize = jnp.dtype(x.dtype).itemsize

    vmem_limit = _vmem_limit_bytes()

    # Real VMEM footprint of the x block: d_in is lane-padded to 128 and the block is
    # double-buffered by the pipeline.  Reserve some fixed slack for weights, biases,
    # the (1, tile_b) output buffers and compiler scratch.
    padded_din = _round_up(d_in, 128)
    fixed_bytes = 4 * _MIB
    tile_cap = (vmem_limit - fixed_bytes) // (2 * padded_din * itemsize)
    tile_cap = max(128, (int(tile_cap) // 128) * 128)

    tile_b = max(128, (int(tile_b) // 128) * 128)
    tile_b = min(tile_b, tile_cap)

    # Ensure >= 2 grid steps when the batch allows it, so "parallel" can use both
    # TensorCores on v7x (harmless elsewhere).
    if B > 128 and pl.cdiv(B, tile_b) < 2:
        tile_b = max(128, _round_up(pl.cdiv(B, 2), 128))

    grid = (pl.cdiv(B, tile_b),)

    out = pl.pallas_call(
        branch_kernel,
        out_shape=jax.ShapeDtypeStruct((1, B), x.dtype),
        grid=grid,
        in_specs=[
            # x: streamed tile-by-tile along batch (partial boundary block, no jnp.pad).
            pl.BlockSpec((tile_b, d_in), lambda i: (i, 0)),
            # Weights / biases: constant block index -> fetched once, VMEM-resident.
            pl.BlockSpec((d_in, d_hid), lambda i: (0, 0)),
            pl.BlockSpec((1, d_hid), lambda i: (0, 0)),
            pl.BlockSpec((1, d_hid), lambda i: (0, 0)),
            # Scalar output bias lives in SMEM.
            pl.BlockSpec(memory_space=pltpu.MemorySpace.SMEM),
        ],
        out_specs=pl.BlockSpec((1, tile_b), lambda i: (0, i)),
        compiler_params=pltpu.CompilerParams(
            dimension_semantics=("parallel",),
            vmem_limit_bytes=vmem_limit,
        ),
    )(x, w1, b1, w2, b2)

    # (1, B) lane-dense slab -> (B, 1) column expected by the PyTorch module.
    return out.reshape(B, 1)


def init_branch_params(key, input_size, output_size, dtype=jnp.float32):
    """Deterministic synthetic init matching nn.Linear shapes (fc1 stored transposed)."""
    k1, k2, k3, k4 = jax.random.split(key, 4)
    lim1 = 1.0 / jnp.sqrt(input_size)
    lim2 = 1.0 / jnp.sqrt(output_size)
    w1 = jax.random.uniform(k1, (input_size, output_size), dtype, -lim1, lim1)
    b1 = jax.random.uniform(k2, (1, output_size), dtype, -lim1, lim1)
    w2 = jax.random.uniform(k3, (1, output_size), dtype, -lim2, lim2)  # torch layout (1, d_hid)
    b2 = jax.random.uniform(k4, (1, 1), dtype, -lim2, lim2)
    return w1, b1, w2, b2


if __name__ == "__main__":
    key = jax.random.PRNGKey(0)
    kx, kp = jax.random.split(key)

    # Batch not tile-aligned -> exercises the partial boundary block and a 2-step grid
    # (the >=2-step heuristic shrinks tile_b to 256 here).
    batch, input_size, output_size = 300, 32, 16
    x = jax.random.normal(kx, (batch, input_size), jnp.float32)
    w1, b1, w2, b2 = init_branch_params(kp, input_size, output_size)

    out = branch_forward(x, w1, b1, w2, b2)
    out = jax.block_until_ready(out)

    # Pure-JAX reference of the same math.
    ref = jnp.maximum(x @ w1 + b1, 0.0) @ w2.T + b2
    assert out.shape == (batch, 1)
    assert jnp.allclose(out, ref, atol=1e-5, rtol=1e-5)

    print("KERNEL_OK")
</pallas_src>

<mosaic_0001>
module attributes {stable_mosaic.version = 11 : i64} {
  func.func @branch_kernel(%arg0: i32, %arg1: memref<256x32xf32, #tpu.memory_space<vmem>>, %arg2: memref<32x16xf32, #tpu.memory_space<vmem>>, %arg3: memref<1x16xf32, #tpu.memory_space<vmem>>, %arg4: memref<1x16xf32, #tpu.memory_space<vmem>>, %arg5: memref<1x1xf32, #tpu.memory_space<smem>>, %arg6: memref<1x256xf32, #tpu.memory_space<vmem>>) attributes {dimension_semantics = [#tpu.dimension_semantics<parallel>], iteration_bounds = array<i64: 2>, scalar_prefetch = 0 : i64, scratch_operands = 0 : i64, tpu.core_type = #tpu.core_type<tc>, window_params = [{transform_indices = @transform_0, window_bounds = array<i64: 256, 32>}, {pipeline_mode = #tpu.pipeline_mode<synchronous>, transform_indices = @transform_1, window_bounds = array<i64: 32, 16>}, {pipeline_mode = #tpu.pipeline_mode<synchronous>, transform_indices = @transform_2, window_bounds = array<i64: 1, 16>}, {pipeline_mode = #tpu.pipeline_mode<synchronous>, transform_indices = @transform_3, window_bounds = array<i64: 1, 16>}, {transform_indices = @transform_4, window_bounds = array<i64: 1, 1>}, {transform_indices = @transform_5, window_bounds = array<i64: 1, 256>}]} {
    %c0 = arith.constant 0 : index
    %c0_0 = arith.constant 0 : index
    %0 = vector.load %arg1[%c0, %c0_0] : memref<256x32xf32, #tpu.memory_space<vmem>>, vector<256x32xf32>
    %c0_1 = arith.constant 0 : index
    %c0_2 = arith.constant 0 : index
    %1 = vector.load %arg2[%c0_1, %c0_2] : memref<32x16xf32, #tpu.memory_space<vmem>>, vector<32x16xf32>
    %cst = arith.constant dense<0.000000e+00> : vector<256x16xf32>
    %2 = tpu.matmul %0, %1, %cst {dimension_numbers = #tpu.dot_dimension_numbers<[1], [0], [0], [1], [0, 0, 1, 1], [], []>} : vector<256x32xf32>, vector<32x16xf32>, vector<256x16xf32> -> vector<256x16xf32>
    %c0_3 = arith.constant 0 : index
    %c0_4 = arith.constant 0 : index
    %3 = vector.load %arg3[%c0_3, %c0_4] : memref<1x16xf32, #tpu.memory_space<vmem>>, vector<1x16xf32>
    %4 = vector.broadcast %3 : vector<1x16xf32> to vector<256x16xf32>
    %5 = arith.addf %2, %4 : vector<256x16xf32>
    %cst_5 = arith.constant 0.000000e+00 : f32
    %6 = vector.broadcast %cst_5 : f32 to vector<256x16xf32>
    %7 = arith.maximumf %5, %6 : vector<256x16xf32>
    %c0_6 = arith.constant 0 : index
    %c0_7 = arith.constant 0 : index
    %8 = vector.load %arg4[%c0_6, %c0_7] : memref<1x16xf32, #tpu.memory_space<vmem>>, vector<1x16xf32>
    %cst_8 = arith.constant dense<0.000000e+00> : vector<1x256xf32>
    %9 = tpu.matmul %8, %7, %cst_8 {dimension_numbers = #tpu.dot_dimension_numbers<[1], [1], [0], [0], [0, 0, 1, 0], [], []>} : vector<1x16xf32>, vector<256x16xf32>, vector<1x256xf32> -> vector<1x256xf32>
    %c0_9 = arith.constant 0 : index
    %c0_10 = arith.constant 0 : index
    %10 = memref.load %arg5[%c0_9, %c0_10] : memref<1x1xf32, #tpu.memory_space<smem>>
    %11 = vector.broadcast %10 : f32 to vector<1x256xf32>
    %12 = arith.addf %9, %11 : vector<1x256xf32>
    %c0_11 = arith.constant 0 : index
    %c0_12 = arith.constant 0 : index
    %13 = vector.load %arg6[%c0_11, %c0_12] : memref<1x256xf32, #tpu.memory_space<vmem>>, vector<1x256xf32>
    tpu.vector_store %arg6[%c0_11, %c0_12], %12 {strides = array<i32>} : memref<1x256xf32, #tpu.memory_space<vmem>>, vector<1x256xf32>,
    return
  }
  func.func @transform_0(%arg0: i32) -> (i32, i32) {
    %c0_i32 = arith.constant 0 : i32
    %c0_i32_0 = arith.constant 0 : i32
    return %arg0, %c0_i32 : i32, i32
  }
  func.func @transform_1(%arg0: i32) -> (i32, i32) {
    %c0_i32 = arith.constant 0 : i32
    %c0_i32_0 = arith.constant 0 : i32
    %c0_i32_1 = arith.constant 0 : i32
    return %c0_i32, %c0_i32_0 : i32, i32
  }
  func.func @transform_2(%arg0: i32) -> (i32, i32) {
    %c0_i32 = arith.constant 0 : i32
    %c0_i32_0 = arith.constant 0 : i32
    %c0_i32_1 = arith.constant 0 : i32
    return %c0_i32, %c0_i32_0 : i32, i32
  }
  func.func @transform_3(%arg0: i32) -> (i32, i32) {
    %c0_i32 = arith.constant 0 : i32
    %c0_i32_0 = arith.constant 0 : i32
    %c0_i32_1 = arith.constant 0 : i32
    return %c0_i32, %c0_i32_0 : i32, i32
  }
  func.func @transform_4(%arg0: i32) -> (i32, i32) {
    %c0_i32 = arith.constant 0 : i32
    %c0_i32_0 = arith.constant 0 : i32
    %c0_i32_1 = arith.constant 0 : i32
    return %c0_i32, %c0_i32_0 : i32, i32
  }
  func.func @transform_5(%arg0: i32) -> (i32, i32) {
    %c0_i32 = arith.constant 0 : i32
    %c0_i32_0 = arith.constant 0 : i32
    return %c0_i32, %arg0 : i32, i32
  }
}

</mosaic_0001>

<bundles_post_ra>
// kernel: tpu_custom_call.1
= control target key start
LH: loop header
LB: loop body
LE: loop exit
PB: predicated region body
PF: predicated region fallthrough
CT: control target
= control target key end

     0   :  { %s1293_s0 = inlined_call_operand.vmem [shape: f32[300,32], index: 0, kind: input, shape index: {}]   ;;  %s1294_s1 = inlined_call_operand.vmem [shape: f32[32,16], index: 1, kind: input, shape index: {}]   ;;  %s1295_s2 = inlined_call_operand.vmem [shape: f32[1,16], index: 2, kind: input, shape index: {}]   ;;  %s1296_s3 = inlined_call_operand.vmem [shape: f32[1,16], index: 3, kind: input, shape index: {}]   ;;  %s1297_s4 = inlined_call_operand.<no memory space> [shape: f32[1,1], index: 4, kind: input, shape index: {}]   ;;  %s1298_s5 = inlined_call_operand.hbm [shape: f32[1,300], index: 5, kind: output, shape index: {}]  }
   0x1   :  { %10 = sst [smem:[#allocation2]] %s1297_s4 }
   0x2   :  { %11 = vsyncpa [#allocation4], 0 }
   0x3   :  { %13 = vsyncpa [#allocation4 + $0x1], 0  ;;  %s1000_s20 = smov 0   ;;  %s1002_s21 = smov 0  }
   0x4   :  { %s1004_s22 = smov 0   ;;  %s1006_s23 = smov 0  }
   0x5 LB: > { %s1021_s4 = sadd.s32 4294967295, %s964_s23   ;;  %s766_s24 = sadd.s32 4294967294, %s964_s23   ;;  %s964_s23 = sphi %s1006_s23, %s1304_s23   ;;  %s960_s22 = sphi %s1004_s22, %s1303_s22   ;;  %s956_s21 = sphi %s1002_s21, %s1302_s21   ;;  %s952_s20 = sphi %s1000_s20, %s1301_s20  }
   0x6   : > { %s1025_s25 = sadd.s32 1, %s964_s23   ;;  %s136_s26 = sadd.s32 1, %s960_s22 }
   0x7   : > { %s133_s27 = ssub.s32 %s964_s23, %s1025_s25  ;;  %p146_p0 = scmp.ne.s32.totalorder %s960_s22, %s956_s21 }
   0x8   : > { %p134_p1 = scmp.eq.s32.totalorder %s133_s27, 0  ;;  %p147_p2 = scmp.eq.s32.totalorder %s1021_s4, 1 }
   0x9   : > { %p152_p3 = scmp.ne.s32.totalorder %s956_s21, %s952_s20  ;;  %p153_p4 = scmp.eq.s32.totalorder %s766_s24, 1 }
   0xa   : > { %s1036_s28 = scalar_select %p134_p1, %s960_s22, %s136_s26  }
   0xb   : > { %p1038_p5 = por %p147_p2, %p146_p0  ;;  %p1042_p6 = por %p153_p4, %p152_p3 }
   0xc   : > { %p769_p7 = scmp.ge.s32.totalorder %s964_s23, 1  ;;  %p200_p8 = scmp.lt.s32.totalorder %s964_s23, 3 }
   0xe   : > { %p201_p9 = pnand %p769_p7, %p200_p8 }
   0xf   : > { %s771_s10 = sshll.u32 (!%p201_p9), %s1021_s4, 5  ;;  %s229_s6 = sand.u32 (!%p201_p9), 1, %s956_s21  }
  0x10   : > { %204 = sbr.rel (%p201_p9) target bundleno = 475 (0x1db), region = 40  ;;  %p237_p10 = scmp.lt.s32.totalorder (!%p201_p9), %s771_s10, 37 }
  0x11   : > { %s533_s7 = sld [smem:[#allocation2]] (!%p201_p9)  ;;  %s770_s8 = sshll.u32 (!%p201_p9), %s229_s6, 1 }
  0x12   : > { %s231_s9 = scalar_lea.vmem (!%p201_p9), [#allocation3], %s770_s8 }
  0x15   : > { %v285_v0 = vld [vmem:[%s1294_s1 + $0x18] sm:$0xff]  ;;  %v284_v1 = vld [vmem:[%s1294_s1 + $0x10] sm:$0xff]  ;;  %v283_v2 = vld [vmem:[%s1294_s1 + $0x8] sm:$0xff]  ;;  %s1306_s10 = smov (!%p237_p10, %s771_s10), 37  ;;  %vm290_vm0 = vcmask 261120   ;;  %vm535_vm1 = vcmask 130048  }
  0x16   : > { %399 = vmatpush.msra.mxu0 %v285_v0  ;;  %845 = vmatpush.msra.mxu3 %v285_v0  ;;  %v282_v3 = vld [vmem:[%s1294_s1] sm:$0xff]  ;;  %s772_s15 = sshll.u32 %s1306_s10, 3  ;;  %vm678_vm2 = vcmask 1040384   ;;  %s1238_s10 = scalar_lea.sflag [#allocation4], %s229_s6 }
  0x17   : > { %844 = vmatpush.msra.mxu1 %v285_v0  ;;  %s1064_s18 = scalar_lea.vmem %s1293_s0, %s772_s15  ;;  %v1147_v46 = vld [vmem:[%s1295_s2] ss:$0 sm:$0xff]  ;;  %s840_s11 = sshll.u32 (%p1038_p5), %s1021_s4, 1 }
  0x18   : > { %400 = vmatpush.msra.mxu0 %v284_v1  ;;  %847 = vmatpush.msra.mxu3 %v284_v1  ;;  %v250_v4 = vld [vmem:[%s1064_s18] sm:$0xff]  ;;  %v271_v5 = vld [vmem:[%s1064_s18 + $0xa8] sm:$0xff]  ;;  %v272_v8 = vld [vmem:[%s1064_s18 + $0xb0] sm:$0xff]  ;;  %s695_s12 = ssub.s32 (%p1038_p5), 3, %s840_s11 }
  0x19   : > { %846 = vmatpush.msra.mxu1 %v284_v1  ;;  %v262_v6 = vld [vmem:[%s1064_s18 + $0x60] sm:$0xff]  ;;  %v251_v7 = vld [vmem:[%s1064_s18 + $0x8] sm:$0xff]  ;;  %v252_v10 = vld [vmem:[%s1064_s18 + $0x10] sm:$0xff]  ;;  %p696_p11 = scmp.lt.s32.totalorder (%p1038_p5), %s695_s12, 2 }
  0x1a   : > { %401 = vmatpush.msra.mxu0 %v283_v2  ;;  %849 = vmatpush.msra.mxu3 %v283_v2  ;;  %v263_v9 = vld [vmem:[%s1064_s18 + $0x68] sm:$0xff]  ;;  %v273_v11 = vld [vmem:[%s1064_s18 + $0xb8] sm:$0xff]  ;;  %v264_v12 = vld [vmem:[%s1064_s18 + $0x70] sm:$0xff] }
  0x1b   : > { %848 = vmatpush.msra.mxu1 %v283_v2  ;;  %v253_v13 = vld [vmem:[%s1064_s18 + $0x18] sm:$0xff]  ;;  %v274_v14 = vld [vmem:[%s1064_s18 + $0xc0] sm:$0xff]  ;;  %v275_v17 = vld [vmem:[%s1064_s18 + $0xc8] sm:$0xff] }
  0x1c   : > { %402 = vmatpush.msra.mxu0 %v282_v3  ;;  %851 = vmatpush.msra.mxu3 %v282_v3  ;;  %v265_v15 = vld [vmem:[%s1064_s18 + $0x78] sm:$0xff]  ;;  %v254_v16 = vld [vmem:[%s1064_s18 + $0x20] sm:$0xff]  ;;  %v255_v18 = vld [vmem:[%s1064_s18 + $0x28] sm:$0xff] }
  0x1d   : > { %773 = vmatmul.msk.f32.vlgmr.msra.gmra.mxu0 %vm290_vm0, %v250_v4  ;;  %794 = vmatmul.msk.f32.vlgmr.msra.gmra.mxu3 %vm290_vm0, %v271_v5  ;;  %v276_v19 = vld [vmem:[%s1064_s18 + $0xd0] sm:$0xff]  ;;  %v277_v21 = vld [vmem:[%s1064_s18 + $0xd8] sm:$0xff]  ;;  %v278_v23 = vld [vmem:[%s1064_s18 + $0xe0] sm:$0xff] }
  0x1e   : > { %850 = vmatpush.msra.mxu1 %v282_v3  ;;  %v256_v20 = vld [vmem:[%s1064_s18 + $0x30] sm:$0xff]  ;;  %v257_v22 = vld [vmem:[%s1064_s18 + $0x38] sm:$0xff]  ;;  %v266_v24 = vld [vmem:[%s1064_s18 + $0x80] sm:$0xff] }
  0x1f   : > { %785 = vmatmul.msk.f32.vlgmr.msra.gmra.mxu1 %vm290_vm0, %v262_v6  ;;  %v258_v25 = vld [vmem:[%s1064_s18 + $0x40] sm:$0xff]  ;;  %v279_v26 = vld [vmem:[%s1064_s18 + $0xe8] sm:$0xff]  ;;  %v280_v29 = vld [vmem:[%s1064_s18 + $0xf0] sm:$0xff] }
  0x20   : > { %v267_v27 = vld [vmem:[%s1064_s18 + $0x88] sm:$0xff]  ;;  %v268_v30 = vld [vmem:[%s1064_s18 + $0x90] sm:$0xff]  ;;  %v281_v32 = vld [vmem:[%s1064_s18 + $0xf8] sm:$0xff] }
  0x21   : > { %v259_v28 = vld [vmem:[%s1064_s18 + $0x48] sm:$0xff]  ;;  %v260_v31 = vld [vmem:[%s1064_s18 + $0x50] sm:$0xff]  ;;  %v269_v33 = vld [vmem:[%s1064_s18 + $0x98] sm:$0xff] }
  0x22   : > { %v261_v34 = vld [vmem:[%s1064_s18 + $0x58] sm:$0xff]  ;;  %v270_v35 = vld [vmem:[%s1064_s18 + $0xa0] sm:$0xff] }
  0x25   : > { %774 = vmatmul.msk.f32.gmra.mxu0 %vm290_vm0, %v251_v7  ;;  %795 = vmatmul.msk.f32.gmra.mxu3 %vm290_vm0, %v272_v8 }
  0x27   : > { %786 = vmatmul.msk.f32.gmra.mxu1 %vm290_vm0, %v263_v9 }
  0x2d   : > { %775 = vmatmul.msk.f32.gmra.mxu0 %vm290_vm0, %v252_v10  ;;  %796 = vmatmul.msk.f32.gmra.mxu3 %vm290_vm0, %v273_v11 }
  0x2f   : > { %787 = vmatmul.msk.f32.gmra.mxu1 %vm290_vm0, %v264_v12 }
  0x35   : > { %776 = vmatmul.msk.f32.gmra.mxu0 %vm290_vm0, %v253_v13  ;;  %797 = vmatmul.msk.f32.gmra.mxu3 %vm290_vm0, %v274_v14 }
  0x37   : > { %788 = vmatmul.msk.f32.gmra.mxu1 %vm290_vm0, %v265_v15 }
  0x3d   : > { %777 = vmatmul.msk.f32.gmra.mxu0 %vm290_vm0, %v254_v16  ;;  %798 = vmatmul.msk.f32.gmra.mxu3 %vm290_vm0, %v275_v17 }
  0x3f   : > { %789 = vmatmul.msk.f32.gmra.mxu1 %vm290_vm0, %v266_v24 }
  0x45   : > { %778 = vmatmul.msk.f32.gmra.mxu0 %vm290_vm0, %v255_v18  ;;  %799 = vmatmul.msk.f32.gmra.mxu3 %vm290_vm0, %v276_v19 }
  0x47   : > { %790 = vmatmul.msk.f32.gmra.mxu1 %vm290_vm0, %v267_v27 }
  0x4d   : > { %779 = vmatmul.msk.f32.gmra.mxu0 %vm290_vm0, %v256_v20  ;;  %800 = vmatmul.msk.f32.gmra.mxu3 %vm290_vm0, %v277_v21 }
  0x4f   : > { %791 = vmatmul.msk.f32.gmra.mxu1 %vm290_vm0, %v268_v30 }
  0x55   : > { %780 = vmatmul.msk.f32.gmra.mxu0 %vm290_vm0, %v257_v22  ;;  %801 = vmatmul.msk.f32.gmra.mxu3 %vm290_vm0, %v278_v23 }
  0x57   : > { %792 = vmatmul.msk.f32.gmra.mxu1 %vm290_vm0, %v269_v33 }
  0x5d   : > { %781 = vmatmul.msk.f32.gmra.mxu0 %vm290_vm0, %v258_v25  ;;  %802 = vmatmul.msk.f32.gmra.mxu3 %vm290_vm0, %v279_v26 }
  0x5f   : > { %793 = vmatmul.msk.f32.gmra.mxu1 %vm290_vm0, %v270_v35 }
  0x65   : > { %782 = vmatmul.msk.f32.gmra.mxu0 %vm290_vm0, %v259_v28  ;;  %803 = vmatmul.msk.f32.gmra.mxu3 %vm290_vm0, %v280_v29 }
  0x6d   : > { %783 = vmatmul.msk.f32.gmra.mxu0 %vm290_vm0, %v260_v31  ;;  %804 = vmatmul.msk.f32.gmra.mxu3 %vm290_vm0, %v281_v32 }
  0x75   : > { %784 = vmatmul.msk.f32.gmra.mxu0 %vm290_vm0, %v261_v34 }
  0x9a   : > { %v1130_v36 = vpop.f32.mrf.mxu0 }
  0x9c   : > { %v440_v37 = vpop.f32.mrf.mxu1 }
  0x9d   : > { %v441_v55 = vadd.f32 %v1147_v46, %v440_v37 }
  0x9f   : > { %v512_v58 = vmax.f32 %v441_v55, 0.0 }
  0xa0   : > { %v1132_v38 = vpop.f32.mrf.mxu3 }
  0xa2   : > { %v1134_v39 = vpop.f32.mrf.mxu0 }
  0xa4   : > { %v443_v40 = vpop.f32.mrf.mxu1 }
  0xa5   : > { %v444_v52 = vadd.f32 %v1147_v46, %v443_v40 }
  0xa7   : > { %v513_v56 = vmax.f32 %v444_v52, 0.0 }
  0xa8   : > { %v1136_v41 = vpop.f32.mrf.mxu3 }
  0xa9   : > { %v471_v55 = vadd.f32 %v1147_v46, %v1136_v41 }
  0xaa   : > { %v1138_v42 = vpop.f32.mrf.mxu0 }
  0xac   : > { %v446_v43 = vpop.f32.mrf.mxu1 }
  0xad   : > { %v447_v48 = vadd.f32 %v1147_v46, %v446_v43 }
  0xaf   : > { %v514_v53 = vmax.f32 %v447_v48, 0.0 }
  0xb0   : > { %v1140_v44 = vpop.f32.mrf.mxu3 }
  0xb2   : > { %v1142_v45 = vpop.f32.mrf.mxu0 }
  0xb4   : > { %v449_v47 = vpop.f32.mrf.mxu1 }
  0xb5   : > { %v450_v49 = vadd.f32 %v1147_v46, %v449_v47 }
  0xb7   : > { %v515_v50 = vmax.f32 %v450_v49, 0.0 }
  0xb8   : > { %v1151_v51 = vpop.f32.mrf.mxu3 }
  0xb9   : > { %805 = vmatpush.xpose.msk.msrb.mxu1 %vm535_vm1, %v515_v50  ;;  %v477_v40 = vadd.f32 %v1147_v46, %v1151_v51  ;;  %v474_v50 = vadd.f32 %v1147_v46, %v1140_v44 }
  0xba   : > { %v1155_v54 = vpop.f32.mrf.mxu0 }
  0xbb   : > { %v417_v48 = vadd.f32 %v1147_v46, %v1155_v54  ;;  %v524_v52 = vmax.f32 %v477_v40, 0.0  ;;  %v411_v54 = vadd.f32 %v1147_v46, %v1138_v42  ;;  %v405_v42 = vadd.f32 %v1147_v46, %v1130_v36  ;;  %v532_v36 = vld [vmem:[%s1296_s3] sm:$0x1] }
  0xbc   : > { %v1161_v6 = vpop.f32.mrf.mxu1 }
  0xbd   : > { %806 = vmatpush.xpose.msk.msrb.mxu1 %vm535_vm1, %v514_v53  ;;  %v414_v53 = vadd.f32 %v1147_v46, %v1142_v45  ;;  %v504_v51 = vmax.f32 %v417_v48, 0.0  ;;  %v522_v45 = vmax.f32 %v471_v55, 0.0  ;;  %v502_v41 = vmax.f32 %v411_v54, 0.0 }
  0xc0   : > { %v479_v57 = vpop.f32.mrf.mxu3 }
  0xc1   : > { %807 = vmatpush.xpose.msk.msrb.mxu1 %vm535_vm1, %v513_v56  ;;  %v480_v33 = vadd.f32 %v1147_v46, %v479_v57  ;;  %v523_v56 = vmax.f32 %v474_v50, 0.0  ;;  %v503_v57 = vmax.f32 %v414_v53, 0.0 }
  0xc2   : > { %v419_v59 = vpop.f32.mrf.mxu0 }
  0xc3   : > { %v420_v35 = vadd.f32 %v1147_v46, %v419_v59  ;;  %v525_v43 = vmax.f32 %v480_v33, 0.0  ;;  %v408_v59 = vadd.f32 %v1147_v46, %v1134_v39  ;;  %v500_v39 = vmax.f32 %v405_v42, 0.0 }
  0xc4   : > { %v1170_v18 = vpop.f32.mrf.mxu1 }
  0xc5   : > { %808 = vmatpush.xpose.msk.msrb.mxu1 %vm535_vm1, %v512_v58  ;;  %v505_v49 = vmax.f32 %v420_v35, 0.0  ;;  %v468_v58 = vadd.f32 %v1147_v46, %v1132_v38 }
  0xc8   : > { %v482_v60 = vpop.f32.mrf.mxu3 }
  0xc9   : > { %v483_v29 = vadd.f32 %v1147_v46, %v482_v60 }
  0xca   : > { %v422_v61 = vpop.f32.mrf.mxu0 }
  0xcb   : > { %v423_v31 = vadd.f32 %v1147_v46, %v422_v61  ;;  %v526_v34 = vmax.f32 %v483_v29, 0.0  ;;  %v521_v61 = vmax.f32 %v468_v58, 0.0 }
  0xcc   : > { %v458_v28 = vpop.f32.mrf.mxu1 }
  0xcd   : > { %v506_v37 = vmax.f32 %v423_v31, 0.0 }
  0xd0   : > { %v485_v62 = vpop.f32.mrf.mxu3 }
  0xd1   : > { %v486_v24 = vadd.f32 %v1147_v46, %v485_v62  ;;  %v501_v62 = vmax.f32 %v408_v59, 0.0 }
  0xd2   : > { %v425_v63 = vpop.f32.mrf.mxu0 }
  0xd3   : > { %v426_v26 = vadd.f32 %v1147_v46, %v425_v63  ;;  %v527_v30 = vmax.f32 %v486_v24, 0.0 }
  0xd4   : > { %v461_v47 = vpop.f32.mrf.mxu1 }
  0xd5   : > { %v507_v32 = vmax.f32 %v426_v26, 0.0  ;;  %v462_v38 = vadd.f32 %v1147_v46, %v461_v47 }
  0xd8   : > { %v488_v0 = vpop.f32.mrf.mxu3 }
  0xd9   : > { %v489_v20 = vadd.f32 %v1147_v46, %v488_v0  ;;  %v459_v0 = vadd.f32 %v1147_v46, %v458_v28 }
  0xda   : > { %v428_v1 = vpop.f32.mrf.mxu0 }
  0xdb   : > { %v429_v22 = vadd.f32 %v1147_v46, %v428_v1  ;;  %v528_v25 = vmax.f32 %v489_v20, 0.0  ;;  %v519_v1 = vmax.f32 %v462_v38, 0.0 }
  0xdc   : > { %v464_v44 = vpop.f32.mrf.mxu1 }
  0xdd   : > { %v508_v27 = vmax.f32 %v429_v22, 0.0  ;;  %v465_v60 = vadd.f32 %v1147_v46, %v464_v44 }
  0xdf   : > { %v520_v63 = vmax.f32 %v465_v60, 0.0 }
  0xe0   : > { %v491_v2 = vpop.f32.mrf.mxu3 }
  0xe1   : > { %v492_v15 = vadd.f32 %v1147_v46, %v491_v2  ;;  %v456_v2 = vadd.f32 %v1147_v46, %v1170_v18 }
  0xe2   : > { %v431_v3 = vpop.f32.mrf.mxu0 }
  0xe3   : > { %v432_v19 = vadd.f32 %v1147_v46, %v431_v3  ;;  %v529_v21 = vmax.f32 %v492_v15, 0.0  ;;  %v518_v3 = vmax.f32 %v459_v0, 0.0 }
  0xe5   : > { %v509_v23 = vmax.f32 %v432_v19, 0.0 }
  0xe8   : > { %v494_v4 = vpop.f32.mrf.mxu3 }
  0xe9   : > { %v495_v10 = vadd.f32 %v1147_v46, %v494_v4  ;;  %v453_v4 = vadd.f32 %v1147_v46, %v1161_v6 }
  0xea   : > { %v434_v5 = vpop.f32.mrf.mxu0 }
  0xeb   : > { %v435_v11 = vadd.f32 %v1147_v46, %v434_v5  ;;  %v530_v16 = vmax.f32 %v495_v10, 0.0  ;;  %v517_v5 = vmax.f32 %v456_v2, 0.0  ;;  %v681_v10 = vlaneseq }
  0xed   : > { %v510_v17 = vmax.f32 %v435_v11, 0.0  ;;  %vm683_vm3 = vcmp.lt.s32.totalorder %v681_v10, 256 }
  0xf0   : > { %v497_v7 = vpop.f32.mrf.mxu3 }
  0xf1   : > { %v498_v8 = vadd.f32 %v1147_v46, %v497_v7  ;;  %v516_v7 = vmax.f32 %v453_v4, 0.0 }
  0xf2   : > { %v437_v9 = vpop.f32.mrf.mxu0 }
  0xf3   : > { %v531_v12 = vmax.f32 %v498_v8, 0.0  ;;  %v438_v13 = vadd.f32 %v1147_v46, %v437_v9  ;;  %v534_v8 = vstv %s533_s7 }
  0xf5   : > { %v511_v14 = vmax.f32 %v438_v13, 0.0  ;;  %822 = vmatpush.xpose.msk.msra.mxu2 %vm535_vm1, %v531_v12 }
  0xf7   : > { %809 = vmatpush.xpose.msk.msrb.mxu1 %vm535_vm1, %v511_v14 }
  0xf9   : > { %823 = vmatpush.xpose.msk.msra.mxu2 %vm535_vm1, %v530_v16 }
  0xfb   : > { %810 = vmatpush.xpose.msk.msrb.mxu1 %vm535_vm1, %v510_v17 }
  0xfd   : > { %824 = vmatpush.xpose.msk.msra.mxu2 %vm535_vm1, %v529_v21 }
  0xff   : > { %811 = vmatpush.xpose.msk.msrb.mxu1 %vm535_vm1, %v509_v23 }
 0x101   : > { %825 = vmatpush.xpose.msk.msra.mxu2 %vm535_vm1, %v528_v25 }
 0x103   : > { %812 = vmatpush.xpose.msk.msrb.mxu1 %vm535_vm1, %v508_v27 }
 0x105   : > { %826 = vmatpush.xpose.msk.msra.mxu2 %vm535_vm1, %v527_v30 }
 0x107   : > { %813 = vmatpush.xpose.msk.msrb.mxu1 %vm535_vm1, %v507_v32 }
 0x109   : > { %827 = vmatpush.xpose.msk.msra.mxu2 %vm535_vm1, %v526_v34 }
 0x10b   : > { %814 = vmatpush.xpose.msk.msrb.mxu1 %vm535_vm1, %v506_v37 }
 0x10d   : > { %828 = vmatpush.xpose.msk.msra.mxu2 %vm535_vm1, %v525_v43 }
 0x10f   : > { %815 = vmatpush.xpose.msk.msrb.mxu1 %vm535_vm1, %v505_v49 }
 0x111   : > { %829 = vmatpush.xpose.msk.msra.mxu2 %vm535_vm1, %v524_v52 }
 0x113   : > { %816 = vmatpush.xpose.msk.msrb.mxu1 %vm535_vm1, %v504_v51 }
 0x115   : > { %830 = vmatpush.xpose.msk.msra.mxu2 %vm535_vm1, %v523_v56 }
 0x117   : > { %817 = vmatpush.xpose.msk.msrb.mxu1 %vm535_vm1, %v503_v57 }
 0x119   : > { %831 = vmatpush.xpose.msk.msra.mxu2 %vm535_vm1, %v522_v45 }
 0x11b   : > { %818 = vmatpush.xpose.msk.msrb.mxu1 %vm535_vm1, %v502_v41 }
 0x11d   : > { %832 = vmatpush.xpose.msk.msra.mxu2 %vm535_vm1, %v521_v61 }
 0x11f   : > { %819 = vmatpush.xpose.msk.msrb.mxu1 %vm535_vm1, %v501_v62 }
 0x121   : > { %833 = vmatpush.xpose.msk.msra.mxu2 %vm535_vm1, %v520_v63 }
 0x123   : > { %820 = vmatpush.xpose.msk.msrb.mxu1 %vm535_vm1, %v500_v39 }
 0x125   : > { %834 = vmatpush.xpose.msk.msra.mxu2 %vm535_vm1, %v519_v1 }
 0x126   : > { %821 = vmatmul.msk.f32.vlgmr.msrb.gmra.mxu1 %vm535_vm1, %v532_v36 }
 0x129   : > { %835 = vmatpush.xpose.msk.msra.mxu2 %vm535_vm1, %v518_v3 }
 0x12d   : > { %836 = vmatpush.xpose.msk.msra.mxu2 %vm535_vm1, %v517_v5 }
 0x131   : > { %837 = vmatpush.xpose.msk.msra.mxu2 %vm535_vm1, %v516_v7 }
 0x134   : > { %838 = vmatmul.msk.f32.vlgmr.msra.gmra.mxu2 %vm535_vm1, %v532_v36 }
 0x1a3   : > { %v652_v9 = vpop.f32.mrf.mxu1 }
 0x1a4   : > { %v653_v13 = vadd.f32 %v652_v9, %v534_v8 }
 0x1b7   : > { %v672_v11 = vpop.f32.mrf.mxu2 }
 0x1b8   : > { %v673_v12 = vadd.f32 %v672_v11, %v534_v8 }
 0x1b9   : > { %693 = sbr.rel (!%p1038_p5) target bundleno = 475 (0x1db), region = 44 }
 0x1ba   : > { %v677_v14 = vrot.slane %v673_v12, 7 }
 0x1bc   : > { %v679_v46 = vsel %vm678_vm2, %v653_v13, %v677_v14 }
 0x1bd   : > { %685 = vst.msk [vmem:[%s231_s9] sm:$0x3] %vm683_vm3, %v679_v46 }
 0x1be   : > { %s1308_s12 = smov (!%p696_p11, %s695_s12), 2 }
 0x1bf   : > { %s698_s13 = ssub.s32 2, %s1308_s12 }
 0x1c0   : > { %s699_s14 = sshll.u32 %s698_s13, 4 }
 0x1c1   : > { %700 = vsyncadd %s1238_s10, %s699_s14  ;;  %p841_p12 = scmp.ne.s32.totalorder %s1308_s12, 0  ;;  %s702_s29 = scalar_lea.hbm %s1298_s5, %s840_s11 }
 0x1c2   : > { %s703_s17 = sshll.u32 %s1308_s12, 4  ;;  %s1252_s18 = sshll.u32 %s231_s9, 4  ;;  %s705_s18 = int_to_ptr.vmem [resolvable:$true] %s1252_s18 }
 0x1c3   : > { %s706_s4 = sshll.u32 %s702_s29, 4  ;;  %s891_s19 = sshra.s32 %s705_s18, 4  ;;  %s707_s4 = int_to_ptr.hbm [resolvable:$true] %s706_s4  ;;  %s892_s19 = int_to_ptr.vmem [resolvable:$true] %s891_s19 }
 0x1c4   : > { %s893_s24 = sshrl.u32 %s703_s17, 4  ;;  %s966_s27 = smov [#allocation3]  }
 0x1c5   : > { %s898_s26 = scalar_lea.vmem %s892_s19, %s893_s24  ;;  %s902_s6 = scalar_lea.vmem %s966_s27, 4 }
 0x1c6   : > { %p899_p13 = scmp.ne.s32.totalorder %s892_s19, %s898_s26  ;;  %p904_p2 = scmp.lt.s32.totalorder %s902_s6, %s898_s26 }
 0x1c8   : > { %p900_p0 = pnand %p899_p13, %p841_p12 }
 0x1ca   : > { %p901_p1 = pneg %p900_p0 }
 0x1cc   : > { %p906_p3 = pnand %p904_p2, %p901_p1 }
 0x1ce   : > { %909 = shalt.err (!%p906_p3)
}
 0x1cf   : > { %s910_s7 = sshra.s32 %s707_s4, 4  ;;  %s921_s13 = scalar_lea.hbm %s1298_s5, 3  ;;  %s911_s7 = int_to_ptr.hbm [resolvable:$true] %s910_s7 }
 0x1d0   : > { %s917_s8 = scalar_lea.hbm %s911_s7, %s893_s24  ;;  %p922_p8 = scmp.lt.s32.totalorder %s911_s7, %s1298_s5 }
 0x1d1   : > { %p918_p4 = scmp.ne.s32.totalorder %s911_s7, %s917_s8  ;;  %p923_p9 = scmp.lt.s32.totalorder %s921_s13, %s917_s8 }
 0x1d3   : > { %p919_p5 = pnand %p918_p4, %p841_p12  ;;  %p924_p10 = por %p923_p9, %p922_p8 }
 0x1d5   : > { %p920_p7 = pneg %p919_p5 }
 0x1d7   : > { %p925_p11 = pnand %p924_p10, %p920_p7 }
 0x1d9   : > { %928 = shalt.err (!%p925_p11)
}
 0x1da   : > { %709 = dma.vmem_to_hbm [thread:$0]  (%p841_p12), %s705_s18, %s703_s17, %s707_s4, %s1238_s10  }
 0x1db PF: > { %p857_p13 = scmp.ge.s32.totalorder %s964_s23, 2  ;;  %s718_s16 = sand.u32 1, %s952_s20  }
 0x1dc   : > { %s719_s29 = scalar_lea.sflag [#allocation4], %s718_s16 }
 0x1dd   : > { %p854_p0 = pnand %p857_p13, %p1042_p6 }
 0x1df   : > { %p855_p1 = pneg %p854_p0 }
 0x1e1   : > { %947 = dma.done.wait (%p855_p1), %s719_s29, 32  }
 0x1e2   : > { %949 = vsyncadd (%p855_p1), %s719_s29, 4294967264  ;;  %p16_p2 = scmp.ge.s32.totalorder %s1025_s25, 4   ;;  %s1301_s20 = smov %s956_s21 }
 0x1e3   : > { %s1302_s21 = smov %s960_s22  ;;  %s1303_s22 = smov %s1036_s28 }
 0x1e4   : > { %s1304_s23 = smov %s1025_s25  ;;  %18 = sbr.rel (!%p16_p2) target bundleno = 5 (0x5), region = 75 }
 0x1e9   :  { %725 = vsyncpa [#allocation4], 1 }
 0x1ea   :  { %727 = vsyncpa [#allocation4 + $0x1], 1 }

</bundles_post_ra>
